<compile_context>
chip_gen: v6e
topology: v6e:2x2x1
jax: 0.10.0
libtpu: 0.0.40
codegen_flags: <defaults>
</compile_context>

<pallas_src>
import jax
import jax.numpy as jnp
from jax import lax
from jax.experimental import pallas as pl
from jax.experimental.pallas import tpu as pltpu


def _linear_kernel(x_ref, w_ref, b_ref, o_ref, acc_ref):
    """One (tm, tn) output tile, accumulated over the K grid axis.

    x_ref:   (tm, tk)  activation tile
    w_ref:   (tn, tk)  weight tile, PyTorch [out, in] layout (never transposed)
    b_ref:   (1,  tn)  bias tile
    o_ref:   (tm, tn)  output tile
    acc_ref: (tm, tn)  float32 VMEM accumulator
    """
    k = pl.program_id(2)

    @pl.when(k == 0)
    def _():
        acc_ref[...] = jnp.zeros_like(acc_ref)

    # Contract dim 1 of x against dim 1 of W:  y = x @ W^T, done on the MXU
    # without any materialized transpose of W.
    acc_ref[...] += lax.dot_general(
        x_ref[...], w_ref[...],
        dimension_numbers=(((1,), (1,)), ((), ())),
        preferred_element_type=jnp.float32)

    @pl.when(k == pl.num_programs(2) - 1)
    def _():
        o_ref[...] = (acc_ref[...] + b_ref[...].astype(jnp.float32)).astype(o_ref.dtype)


def _pick_m_tile(B):
    # tm must be a multiple of 8 or the full batch extent.
    if B > 256:
        return 256          # multiple of 8; >=2 'parallel' steps for large B
    return B                # small batch: single full-extent tile


def _pick_n_tile(N):
    # Lane-dense (multiple of 128) whenever possible.
    for t in (256, 128):
        if N % t == 0:
            return t
    if N > 128:
        return 128          # partial last block is clipped on writeback (correct)
    return N                # tiny N (toy shapes): full extent


def _pick_k_tile(K):
    # K tiles must divide K exactly (padded K blocks would corrupt the sum).
    for t in (512, 256, 128):
        if K % t == 0:
            return t
    return K                # awkward / small K: full extent, single K step


def simple_nn_forward(x, weight, bias):
    """x: [B, K]; weight: [N, K] (PyTorch nn.Linear layout); bias: [N]."""
    B, K = x.shape
    N, K2 = weight.shape
    assert K == K2, "input_dim mismatch"
    assert bias.shape == (N,)

    tm = _pick_m_tile(B)
    tn = _pick_n_tile(N)
    tk = _pick_k_tile(K)

    grid = (pl.cdiv(B, tm), pl.cdiv(N, tn), pl.cdiv(K, tk))

    cost = pl.CostEstimate(
        flops=2 * B * K * N,
        transcendentals=0,
        bytes_accessed=4 * (B * K + N * K + B * N + N))

    return pl.pallas_call(
        _linear_kernel,
        out_shape=jax.ShapeDtypeStruct((B, N), x.dtype),
        grid_spec=pltpu.PrefetchScalarGridSpec(
            num_scalar_prefetch=0,
            grid=grid,
            in_specs=[
                pl.BlockSpec((tm, tk), lambda i, j, k: (i, k)),  # x tile
                pl.BlockSpec((tn, tk), lambda i, j, k: (j, k)),  # W tile ([out,in])
                pl.BlockSpec((1, tn), lambda i, j, k: (0, j)),   # bias tile
            ],
            out_specs=pl.BlockSpec((tm, tn), lambda i, j, k: (i, j)),
            scratch_shapes=[pltpu.VMEM((tm, tn), jnp.float32)],
        ),
        compiler_params=pltpu.CompilerParams(
            dimension_semantics=("parallel", "parallel", "arbitrary")),
        cost_estimate=cost,
    )(x, weight, bias.reshape(1, N))


if __name__ == "__main__":
    key = jax.random.PRNGKey(0)

    def make_case(key, batch, input_dim, output_dim):
        kx, kw, kb = jax.random.split(key, 3)
        bound = 1.0 / (input_dim ** 0.5)
        x = jax.random.normal(kx, (batch, input_dim), dtype=jnp.float32)
        w = jax.random.uniform(kw, (output_dim, input_dim),
                               minval=-bound, maxval=bound, dtype=jnp.float32)
        b = jax.random.uniform(kb, (output_dim,),
                               minval=-bound, maxval=bound, dtype=jnp.float32)
        return x, w, b

    k1, k2 = jax.random.split(key)

    # 1) Toy shapes implied by the module/test: batch=8, input_dim=32, output_dim=16.
    #    (At this size a standalone pallas_call is pure overhead vs. fused XLA dot;
    #     kept here only as a correctness demo of the same kernel.)
    x, w, b = make_case(k1, 8, 32, 16)
    y = simple_nn_forward(x, w, b)
    jax.block_until_ready(y)
    y_ref = x @ w.T + b
    assert y.shape == (8, 16)
    assert jnp.allclose(y, y_ref, atol=1e-4, rtol=1e-4)

    # 2) Moderate shapes that exercise the tiled path: multiple M and K grid
    #    steps, lane-dense (256-wide) output tiles, streamed weight blocks.
    x2, w2, b2 = make_case(k2, 512, 1024, 256)
    y2 = simple_nn_forward(x2, w2, b2)
    jax.block_until_ready(y2)
    y2_ref = x2 @ w2.T + b2
    assert y2.shape == (512, 256)
    assert jnp.allclose(y2, y2_ref, atol=1e-3, rtol=1e-3)

    print("KERNEL_OK")
</pallas_src>

<mosaic_0001>
module attributes {stable_mosaic.version = 11 : i64} {
  func.func @_linear_kernel(%arg0: i32, %arg1: i32, %arg2: i32, %arg3: memref<8x32xf32, #tpu.memory_space<vmem>>, %arg4: memref<16x32xf32, #tpu.memory_space<vmem>>, %arg5: memref<1x16xf32, #tpu.memory_space<vmem>>, %arg6: memref<8x16xf32, #tpu.memory_space<vmem>>, %arg7: memref<8x16xf32, #tpu.memory_space<vmem>>) attributes {dimension_semantics = [#tpu.dimension_semantics<parallel>, #tpu.dimension_semantics<parallel>, #tpu.dimension_semantics<arbitrary>], iteration_bounds = array<i64: 1, 1, 1>, scalar_prefetch = 0 : i64, scratch_operands = 1 : i64, tpu.core_type = #tpu.core_type<tc>, window_params = [{transform_indices = @transform_0, window_bounds = array<i64: 8, 32>}, {transform_indices = @transform_1, window_bounds = array<i64: 16, 32>}, {transform_indices = @transform_2, window_bounds = array<i64: 1, 16>}, {transform_indices = @transform_3, window_bounds = array<i64: 8, 16>}]} {
    %c0_i32 = arith.constant 0 : i32
    %0 = arith.cmpi eq, %arg2, %c0_i32 : i32
    %1 = arith.extui %0 : i1 to i32
    %c0_i32_0 = arith.constant 0 : i32
    %2 = arith.cmpi ne, %1, %c0_i32_0 : i32
    scf.if %2 {
      %cst_10 = arith.constant 0.000000e+00 : f32
      %12 = vector.broadcast %cst_10 : f32 to vector<8x16xf32>
      %c0_11 = arith.constant 0 : index
      %c0_12 = arith.constant 0 : index
      %13 = vector.load %arg7[%c0_11, %c0_12] : memref<8x16xf32, #tpu.memory_space<vmem>>, vector<8x16xf32>
      tpu.vector_store %arg7[%c0_11, %c0_12], %12 {strides = array<i32>} : memref<8x16xf32, #tpu.memory_space<vmem>>, vector<8x16xf32>,
    } else {
    }
    %c0 = arith.constant 0 : index
    %c0_1 = arith.constant 0 : index
    %3 = vector.load %arg7[%c0, %c0_1] : memref<8x16xf32, #tpu.memory_space<vmem>>, vector<8x16xf32>
    %c0_2 = arith.constant 0 : index
    %c0_3 = arith.constant 0 : index
    %4 = vector.load %arg3[%c0_2, %c0_3] : memref<8x32xf32, #tpu.memory_space<vmem>>, vector<8x32xf32>
    %c0_4 = arith.constant 0 : index
    %c0_5 = arith.constant 0 : index
    %5 = vector.load %arg4[%c0_4, %c0_5] : memref<16x32xf32, #tpu.memory_space<vmem>>, vector<16x32xf32>
    %cst = arith.constant dense<0.000000e+00> : vector<8x16xf32>
    %6 = tpu.matmul %4, %5, %cst {dimension_numbers = #tpu.dot_dimension_numbers<[1], [1], [0], [0], [0, 0, 1, 0], [], []>} : vector<8x32xf32>, vector<16x32xf32>, vector<8x16xf32> -> vector<8x16xf32>
    %7 = arith.addf %3, %6 : vector<8x16xf32>
    %c0_6 = arith.constant 0 : index
    %c0_7 = arith.constant 0 : index
    %8 = vector.load %arg7[%c0_6, %c0_7] : memref<8x16xf32, #tpu.memory_space<vmem>>, vector<8x16xf32>
    tpu.vector_store %arg7[%c0_6, %c0_7], %7 {strides = array<i32>} : memref<8x16xf32, #tpu.memory_space<vmem>>, vector<8x16xf32>,
    %c0_i32_8 = arith.constant 0 : i32
    %9 = arith.cmpi eq, %arg2, %c0_i32_8 : i32
    %10 = arith.extui %9 : i1 to i32
    %c0_i32_9 = arith.constant 0 : i32
    %11 = arith.cmpi ne, %10, %c0_i32_9 : i32
    scf.if %11 {
      %c0_10 = arith.constant 0 : index
      %c0_11 = arith.constant 0 : index
      %12 = vector.load %arg7[%c0_10, %c0_11] : memref<8x16xf32, #tpu.memory_space<vmem>>, vector<8x16xf32>
      %c0_12 = arith.constant 0 : index
      %c0_13 = arith.constant 0 : index
      %13 = vector.load %arg5[%c0_12, %c0_13] : memref<1x16xf32, #tpu.memory_space<vmem>>, vector<1x16xf32>
      %14 = vector.broadcast %13 : vector<1x16xf32> to vector<8x16xf32>
      %15 = arith.addf %12, %14 : vector<8x16xf32>
      %c0_14 = arith.constant 0 : index
      %c0_15 = arith.constant 0 : index
      %16 = vector.load %arg6[%c0_14, %c0_15] : memref<8x16xf32, #tpu.memory_space<vmem>>, vector<8x16xf32>
      tpu.vector_store %arg6[%c0_14, %c0_15], %15 {strides = array<i32>} : memref<8x16xf32, #tpu.memory_space<vmem>>, vector<8x16xf32>,
    } else {
    }
    return
  }
  func.func @transform_0(%arg0: i32, %arg1: i32, %arg2: i32) -> (i32, i32) {
    %c0_i32 = arith.constant 0 : i32
    return %arg0, %arg2 : i32, i32
  }
  func.func @transform_1(%arg0: i32, %arg1: i32, %arg2: i32) -> (i32, i32) {
    %c0_i32 = arith.constant 0 : i32
    return %arg1, %arg2 : i32, i32
  }
  func.func @transform_2(%arg0: i32, %arg1: i32, %arg2: i32) -> (i32, i32) {
    %c0_i32 = arith.constant 0 : i32
    %c0_i32_0 = arith.constant 0 : i32
    return %c0_i32, %arg1 : i32, i32
  }
  func.func @transform_3(%arg0: i32, %arg1: i32, %arg2: i32) -> (i32, i32) {
    %c0_i32 = arith.constant 0 : i32
    return %arg0, %arg1 : i32, i32
  }
}

</mosaic_0001>

<bundles_post_ra>
// kernel: tpu_custom_call.1
= control target key start
LH: loop header
LB: loop body
LE: loop exit
PB: predicated region body
PF: predicated region fallthrough
CT: control target
= control target key end

     0   :  { %8 = vsyncpa [#allocation4], 0  ;;  %s292_s0 = inlined_call_operand.hbm [shape: f32[8,32], index: 0, kind: input, shape index: {}]   ;;  %s293_s1 = inlined_call_operand.hbm [shape: f32[16,32], index: 1, kind: input, shape index: {}]   ;;  %s294_s2 = inlined_call_operand.vmem [shape: f32[1,16], index: 2, kind: input, shape index: {}]   ;;  %s295_s3 = inlined_call_operand.hbm [shape: f32[8,16], index: 3, kind: output, shape index: {}]  }
   0x1   :  { %9 = vsyncpa [#allocation7], 0 }
   0x2   :  { %10 = vsyncpa [#allocation5], 0  ;;  %s250_s12 = smov [#allocation3]   ;;  %s251_s14 = smov [#allocation6]  }
   0x3   :  { %s17_s13 = sshll.u32 %s250_s12, 4  ;;  %s26_s15 = sshll.u32 %s251_s14, 4  ;;  %s18_s13 = int_to_ptr.vmem [resolvable:$true] %s17_s13  ;;  %s27_s15 = int_to_ptr.vmem [resolvable:$true] %s26_s15 }
   0x4   :  { %s192_s16 = scalar_lea.vmem %s18_s13, 128  ;;  %p197_p1 = scmp.lt.s32.totalorder %s18_s13, %s18_s13 }
   0x5   :  { %p193_p0 = scmp.ne.s32.totalorder %s18_s13, %s192_s16  ;;  %p198_p2 = scmp.lt.s32.totalorder %s192_s16, %s192_s16 }
   0x7   :  { %p199_p3 = por %p198_p2, %p197_p1 }
   0x9   :  { %p200_p4 = pnand %p199_p3, %p193_p0 }
   0xb   :  { %203 = shalt.err (!%p200_p4)
}
   0xc   :  { %20 = dma.hbm_to_vmem [thread:$0]  %s292_s0, 128, %s18_s13, [#allocation4]  }
   0xd   :  { %s212_s19 = scalar_lea.vmem %s27_s15, 256  ;;  %p217_p6 = scmp.lt.s32.totalorder %s27_s15, %s27_s15 }
   0xe   :  { %p213_p5 = scmp.ne.s32.totalorder %s27_s15, %s212_s19  ;;  %p218_p7 = scmp.lt.s32.totalorder %s212_s19, %s212_s19 }
  0x10   :  { %p219_p8 = por %p218_p7, %p217_p6 }
  0x12   :  { %p220_p9 = pnand %p219_p8, %p213_p5 }
  0x14   :  { %223 = shalt.err (!%p220_p9)
}
  0x15   :  { %s252_s20 = smov 128   ;;  %s253_s21 = smov 8  }
  0x16   :  { %32 = dma.hbm_to_vmem [thread:$0]  %s293_s1, 256, %s27_s15, [#allocation7], %s252_s20, %s252_s20, %s253_s21  }
  0x17   :  { %244 = dma.done.wait [#allocation4], 128  }
  0x18   :  { %245 = vsyncadd [#allocation4], 4294967168 }
  0x19   :  { %246 = dma.done.wait [#allocation7], 256  }
  0x1a   :  { %247 = vsyncadd [#allocation7], 4294967040  ;;  %vm45_vm0 = vcmask 130048   ;;  %v254_v0 = vmov 0.0   ;;  %vm255_vm1 = vmmov 0   ;;  %vm51_vm2 = vcmask 261120  }
  0x1b   :  { %170 = vmatprep.subr.mxu0 %v254_v0  ;;  %174 = vmatprep.mubr.msk.f32.mxu0 %vm255_vm1, %v254_v0  ;;  %46 = vst.msk [vmem:[#allocation2] sm:$0xff] %vm45_vm0, %v254_v0  ;;  %v50_v1 = vld [vmem:[#allocation6 + $0x8] sm:$0xff]  ;;  %v49_v2 = vld [vmem:[#allocation6] sm:$0xff]  ;;  %v48_v3 = vld [vmem:[#allocation3] sm:$0xff]  ;;  %s256_s24 = smov [#allocation8]  }
  0x1c   :  { %171 = vmatpush3.xpose.msk.msra.mxu0 %vm51_vm2, %v50_v1  ;;  %v166_v8 = vld [vmem:[%s294_s2] ss:$0 sm:$0xff]  ;;  %s153_s25 = sshll.u32 %s256_s24, 4  ;;  %s154_s25 = int_to_ptr.vmem [resolvable:$true] %s153_s25 }
  0x1d   :  { %172 = vmatprep.subr.mxu0 %v254_v0  ;;  %s224_s26 = scalar_lea.vmem %s154_s25, 128  ;;  %p229_p11 = scmp.lt.s32.totalorder %s154_s25, %s154_s25 }
  0x1e   :  { %p225_p10 = scmp.ne.s32.totalorder %s154_s25, %s224_s26  ;;  %p230_p12 = scmp.lt.s32.totalorder %s224_s26, %s224_s26 }
  0x20   :  { %173 = vmatpush3.xpose.msk.msra.mxu0 %vm51_vm2, %v49_v2  ;;  %p231_p13 = por %p230_p12, %p229_p11 }
  0x22   :  { %v47_v4 = vld [vmem:[#allocation2] sm:$0xff]  ;;  %p232_p0 = pnand %p231_p13, %p225_p10 }
  0x23   :  { %175 = vmatmul.mubr.msk.f32.vlgmr.msra.gmra.mxu0 %vm51_vm2, %v48_v3 }
  0xe3   :  { %v127_v5 = vpop.f32.mrf.mxu0 }
  0xe4   :  { %v131_v6 = vadd.f32 %v127_v5, %v47_v4 }
  0xe5   :  { %v176_v7 = vpop.f32.mrf.mxu0 }
  0xe6   :  { %133 = vst.msk [vmem:[#allocation2] sm:$0xff] %vm45_vm0, %v131_v6 }
  0xed   :  { %v137_v9 = vld [vmem:[#allocation2] sm:$0xff] }
  0xee   :  { %v145_v10 = vadd.f32 %v166_v8, %v137_v9 }
  0xf0   :  { %146 = vst.msk [vmem:[#allocation8] sm:$0xff] %vm45_vm0, %v145_v10 }
  0xf1   :  { %235 = shalt.err (!%p232_p0)
}
  0xf2   :  { %156 = dma.vmem_to_hbm [thread:$0]  %s154_s25, 128, %s295_s3, [#allocation5]  }
  0xf3   :  { %248 = dma.done.wait [#allocation5], 128  }
  0xf4   :  { %249 = vsyncadd [#allocation5], 4294967168 }
  0xf5   :  { %160 = vsyncpa [#allocation4], 1 }
  0xf6   :  { %161 = vsyncpa [#allocation7], 1 }
  0xf7   :  { %162 = vsyncpa [#allocation5], 1 }

</bundles_post_ra>
